<compile_context>
chip_gen: v7x
topology: tpu7x:2x2x1
jax: 0.10.0
libtpu: 0.0.40
codegen_flags: <defaults>
</compile_context>

<pallas_src>
import functools

import jax
import jax.numpy as jnp
from jax.experimental import pallas as pl
from jax.experimental.pallas import tpu as pltpu

LANE = 128
NEG_INF = -1e30  # folded into padded b2 lanes; exp() underflows to 0


def _round_up(v, m):
    return (v + m - 1) // m * m


# ----------------------------------------------------------------------------
# Fused kernel: layer1 (+ReLU) -> layer2 -> log_softmax, all resident in VMEM.
# Padded class lanes carry a -1e30 bias, so they never win the row max and
# contribute 0 to the softmax denominator; no in-kernel masking needed.
# ----------------------------------------------------------------------------
def _gcn_fused_kernel(x_ref, adj_ref, w1_ref, b1_ref, w2_ref, b2_ref, o_ref):
    x = x_ref[...]        # [N, F]  bf16
    adj = adj_ref[...]    # [N, N]  bf16

    # ---- Layer 1: h = relu(adj @ (x @ W1) + b1) -----------------------------
    s1 = jnp.dot(x, w1_ref[...], preferred_element_type=jnp.float32)       # [N, Hp] f32
    h = jnp.dot(adj, s1.astype(jnp.bfloat16),
                preferred_element_type=jnp.float32)                        # [N, Hp] f32
    h = jnp.maximum(h + b1_ref[...], 0.0)

    # ---- Layer 2: logits = adj @ (h @ W2) + b2 (pad lanes get -1e30) --------
    s2 = jnp.dot(h.astype(jnp.bfloat16), w2_ref[...],
                 preferred_element_type=jnp.float32)                        # [N, Cp] f32
    logits = jnp.dot(adj, s2.astype(jnp.bfloat16),
                     preferred_element_type=jnp.float32) + b2_ref[...]      # [N, Cp] f32

    # ---- log_softmax (padded lanes are ~-1e30 and ignored by the consumer) --
    m = jnp.max(logits, axis=-1, keepdims=True)
    shifted = logits - m
    lse = jnp.log(jnp.sum(jnp.exp(shifted), axis=-1, keepdims=True))
    o_ref[...] = (shifted - lse).astype(o_ref.dtype)


# ----------------------------------------------------------------------------
# One-time prep: pad weights to lane-dense shapes, fold the class-lane mask
# into b2, and cast matmul operands to bf16. Run ONCE, reuse across calls.
# ----------------------------------------------------------------------------
def prepare_gcn_params(params):
    f, h_dim = params["w1"].shape
    c_dim = params["w2"].shape[1]
    hp = _round_up(h_dim, LANE)
    cp = _round_up(c_dim, LANE)

    w1p = jnp.zeros((f, hp), jnp.float32).at[:, :h_dim].set(params["w1"])
    w2p = jnp.zeros((hp, cp), jnp.float32).at[:h_dim, :c_dim].set(params["w2"])
    b1p = jnp.zeros((1, hp), jnp.float32).at[0, :h_dim].set(params["b1"])
    # Padded class lanes get -1e30 so the in-kernel softmax ignores them.
    b2p = jnp.full((1, cp), NEG_INF, jnp.float32).at[0, :c_dim].set(params["b2"])

    return {
        "w1": w1p.astype(jnp.bfloat16),
        "b1": b1p,                      # biases stay f32 (added post-accumulation)
        "w2": w2p.astype(jnp.bfloat16),
        "b2": b2p,
        "n_classes": c_dim,
        "cp": cp,
    }


def prepare_gcn_inputs(x, adj):
    # One-time bf16 cast of the (fixed) graph features and adjacency.
    # TODO(synk): when F or N are not multiples of 128, also zero-pad them here
    #   (one-time cost) to keep vld / MXU K-dims lane-dense at scale.
    return x.astype(jnp.bfloat16), adj.astype(jnp.bfloat16)


# ----------------------------------------------------------------------------
# Per-call forward: exactly one pallas_call. Returns the padded [N, 128] slab
# of log-probabilities; valid classes are the first `prepped["n_classes"]`
# lanes (consumer indexes them — no per-call slice launch).
# ----------------------------------------------------------------------------
def gcn_forward_padded(x_bf16, adj_bf16, prepped):
    n, f = x_bf16.shape
    hp = prepped["w1"].shape[1]
    cp = prepped["cp"]

    operands = (x_bf16, adj_bf16, prepped["w1"], prepped["b1"],
                prepped["w2"], prepped["b2"])

    vmem_spec = pl.BlockSpec(memory_space=pltpu.MemorySpace.VMEM)

    # Rough resident-VMEM footprint; bump the scoped limit only when the
    # default (16 MiB on v5e) would reject the whole-array-in-VMEM design.
    footprint = (n * f * 2 + n * n * 2 + f * hp * 2 + hp * cp * 2
                 + (hp + cp) * 4 + n * cp * 4
                 + n * (hp + cp) * 4 * 2)          # f32 intermediates headroom
    call_kwargs = {}
    if footprint > (16 << 20):
        call_kwargs["compiler_params"] = pltpu.CompilerParams(
            vmem_limit_bytes=min(int(footprint * 2), 100 << 20))

    return pl.pallas_call(
        _gcn_fused_kernel,
        out_shape=jax.ShapeDtypeStruct((n, cp), jnp.float32),
        in_specs=[vmem_spec] * len(operands),
        out_specs=vmem_spec,
        **call_kwargs,
    )(*operands)


def init_gcn_params(key, n_feats, n_hid, n_classes):
    k1, k2, k3, k4 = jax.random.split(key, 4)
    stdv1 = 1.0 / jnp.sqrt(jnp.float32(n_hid))
    stdv2 = 1.0 / jnp.sqrt(jnp.float32(n_classes))
    return {
        "w1": jax.random.uniform(k1, (n_feats, n_hid), jnp.float32, -stdv1, stdv1),
        "b1": jax.random.uniform(k2, (n_hid,), jnp.float32, -stdv1, stdv1),
        "w2": jax.random.uniform(k3, (n_hid, n_classes), jnp.float32, -stdv2, stdv2),
        "b2": jax.random.uniform(k4, (n_classes,), jnp.float32, -stdv2, stdv2),
    }


if __name__ == "__main__":
    # Small synthetic graph: N nodes, F input features, hidden, classes.
    N, F, H, C = 64, 32, 16, 8

    key = jax.random.PRNGKey(0)
    kx, kadj, kp = jax.random.split(key, 3)

    x = jax.random.normal(kx, (N, F), dtype=jnp.float32)

    # Symmetric row-normalized adjacency with self-loops (typical GCN preproc).
    a = (jax.random.uniform(kadj, (N, N)) < 0.1).astype(jnp.float32)
    a = jnp.maximum(a, a.T) + jnp.eye(N, dtype=jnp.float32)
    adj = a / jnp.sum(a, axis=1, keepdims=True)

    params = init_gcn_params(kp, F, H, C)

    # One-time prep (padding / casting hoisted out of the per-call path).
    prepped = jax.tree_util.tree_map(jax.block_until_ready, prepare_gcn_params(params))
    x_bf16, adj_bf16 = map(jax.block_until_ready, prepare_gcn_inputs(x, adj))

    fwd = jax.jit(functools.partial(gcn_forward_padded, prepped=prepped))
    out_padded = jax.block_until_ready(fwd(x_bf16, adj_bf16))

    # Consumer indexes the valid class lanes (done here once, for the check).
    out = out_padded[:, :C]

    # Reference in plain JAX (f32). The kernel feeds bf16 operands to the MXU
    # with f32 accumulation, so compare with a bf16-appropriate tolerance.
    h_ref = jax.nn.relu(adj @ (x @ params["w1"]) + params["b1"])
    logits_ref = adj @ (h_ref @ params["w2"]) + params["b2"]
    ref = jax.nn.log_softmax(logits_ref, axis=1)

    assert out.shape == (N, C)
    assert bool(jnp.all(jnp.isfinite(out)))
    # log_softmax rows must exponentiate back to a probability distribution.
    assert jnp.allclose(jnp.sum(jnp.exp(out), axis=1), 1.0, atol=1e-3)
    assert jnp.allclose(out, ref, atol=5e-2, rtol=5e-2)

    print("KERNEL_OK")
</pallas_src>

<mosaic_0001>
module attributes {stable_mosaic.version = 11 : i64} {
  func.func @_gcn_fused_kernel(%arg0: memref<64x32xbf16, #tpu.memory_space<vmem>>, %arg1: memref<64x64xbf16, #tpu.memory_space<vmem>>, %arg2: memref<32x128xbf16, #tpu.memory_space<vmem>>, %arg3: memref<1x128xf32, #tpu.memory_space<vmem>>, %arg4: memref<128x128xbf16, #tpu.memory_space<vmem>>, %arg5: memref<1x128xf32, #tpu.memory_space<vmem>>, %arg6: memref<64x128xf32, #tpu.memory_space<vmem>>) attributes {dimension_semantics = [], scalar_prefetch = 0 : i64, scratch_operands = 0 : i64, tpu.core_type = #tpu.core_type<tc>} {
    %c0 = arith.constant 0 : index
    %c0_0 = arith.constant 0 : index
    %0 = vector.load %arg0[%c0, %c0_0] : memref<64x32xbf16, #tpu.memory_space<vmem>>, vector<64x32xbf16>
    %c0_1 = arith.constant 0 : index
    %c0_2 = arith.constant 0 : index
    %1 = vector.load %arg1[%c0_1, %c0_2] : memref<64x64xbf16, #tpu.memory_space<vmem>>, vector<64x64xbf16>
    %c0_3 = arith.constant 0 : index
    %c0_4 = arith.constant 0 : index
    %2 = vector.load %arg2[%c0_3, %c0_4] : memref<32x128xbf16, #tpu.memory_space<vmem>>, vector<32x128xbf16>
    %cst = arith.constant dense<0.000000e+00> : vector<64x128xf32>
    %3 = tpu.matmul %0, %2, %cst {dimension_numbers = #tpu.dot_dimension_numbers<[1], [0], [0], [1], [0, 0, 1, 1], [], []>} : vector<64x32xbf16>, vector<32x128xbf16>, vector<64x128xf32> -> vector<64x128xf32>
    %4 = arith.truncf %3 : vector<64x128xf32> to vector<64x128xbf16>
    %cst_5 = arith.constant dense<0.000000e+00> : vector<64x128xf32>
    %5 = tpu.matmul %1, %4, %cst_5 {dimension_numbers = #tpu.dot_dimension_numbers<[1], [0], [0], [1], [0, 0, 1, 1], [], []>} : vector<64x64xbf16>, vector<64x128xbf16>, vector<64x128xf32> -> vector<64x128xf32>
    %c0_6 = arith.constant 0 : index
    %c0_7 = arith.constant 0 : index
    %6 = vector.load %arg3[%c0_6, %c0_7] : memref<1x128xf32, #tpu.memory_space<vmem>>, vector<1x128xf32>
    %7 = vector.broadcast %6 : vector<1x128xf32> to vector<64x128xf32>
    %8 = arith.addf %5, %7 : vector<64x128xf32>
    %cst_8 = arith.constant 0.000000e+00 : f32
    %9 = vector.broadcast %cst_8 : f32 to vector<64x128xf32>
    %10 = arith.maximumf %8, %9 : vector<64x128xf32>
    %11 = arith.truncf %10 : vector<64x128xf32> to vector<64x128xbf16>
    %c0_9 = arith.constant 0 : index
    %c0_10 = arith.constant 0 : index
    %12 = vector.load %arg4[%c0_9, %c0_10] : memref<128x128xbf16, #tpu.memory_space<vmem>>, vector<128x128xbf16>
    %cst_11 = arith.constant dense<0.000000e+00> : vector<64x128xf32>
    %13 = tpu.matmul %11, %12, %cst_11 {dimension_numbers = #tpu.dot_dimension_numbers<[1], [0], [0], [1], [0, 0, 1, 1], [], []>} : vector<64x128xbf16>, vector<128x128xbf16>, vector<64x128xf32> -> vector<64x128xf32>
    %14 = arith.truncf %13 : vector<64x128xf32> to vector<64x128xbf16>
    %cst_12 = arith.constant dense<0.000000e+00> : vector<64x128xf32>
    %15 = tpu.matmul %1, %14, %cst_12 {dimension_numbers = #tpu.dot_dimension_numbers<[1], [0], [0], [1], [0, 0, 1, 1], [], []>} : vector<64x64xbf16>, vector<64x128xbf16>, vector<64x128xf32> -> vector<64x128xf32>
    %c0_13 = arith.constant 0 : index
    %c0_14 = arith.constant 0 : index
    %16 = vector.load %arg5[%c0_13, %c0_14] : memref<1x128xf32, #tpu.memory_space<vmem>>, vector<1x128xf32>
    %17 = vector.broadcast %16 : vector<1x128xf32> to vector<64x128xf32>
    %18 = arith.addf %15, %17 : vector<64x128xf32>
    %cst_15 = arith.constant dense<0xFF800000> : vector<64xf32>
    %19 = vector.multi_reduction <maximumf>, %18, %cst_15 [1] : vector<64x128xf32> to vector<64xf32>
    %20 = vector.shape_cast %19 : vector<64xf32> to vector<64x1xf32>
    %21 = vector.broadcast %20 : vector<64x1xf32> to vector<64x128xf32>
    %22 = arith.subf %18, %21 : vector<64x128xf32>
    %23 = math.exp %22 : vector<64x128xf32>
    %cst_16 = arith.constant dense<0.000000e+00> : vector<64xf32>
    %24 = vector.multi_reduction <add>, %23, %cst_16 [1] : vector<64x128xf32> to vector<64xf32>
    %25 = vector.shape_cast %24 : vector<64xf32> to vector<64x1xf32>
    %26 = math.log %25 : vector<64x1xf32>
    %27 = vector.broadcast %26 : vector<64x1xf32> to vector<64x128xf32>
    %28 = arith.subf %22, %27 : vector<64x128xf32>
    %c0_17 = arith.constant 0 : index
    %c0_18 = arith.constant 0 : index
    %29 = vector.load %arg6[%c0_17, %c0_18] : memref<64x128xf32, #tpu.memory_space<vmem>>, vector<64x128xf32>
    tpu.vector_store %arg6[%c0_17, %c0_18], %28 {strides = array<i32>} : memref<64x128xf32, #tpu.memory_space<vmem>>, vector<64x128xf32>,
    return
  }
}

</mosaic_0001>

<bundles_post_ra>
// kernel: gcn_forward_padded.1
= control target key start
LH: loop header
LB: loop body
LE: loop exit
PB: predicated region body
PF: predicated region fallthrough
CT: control target
= control target key end

     0   :  { %11 = vsyncpa [#allocation3], 0  ;;  %s1050_s0 = inlined_call_operand.vmem [shape: bf16[64,32], index: 0, kind: input, shape index: {}]   ;;  %s1051_s1 = inlined_call_operand.hbm [shape: bf16[64,64], index: 1, kind: input, shape index: {}]   ;;  %s1052_s2 = inlined_call_operand.hbm [shape: bf16[32,128], index: 2, kind: input, shape index: {}]   ;;  %s1053_s3 = inlined_call_operand.vmem [shape: f32[1,128], index: 3, kind: input, shape index: {}]   ;;  %s1054_s4 = inlined_call_operand.vmem [shape: bf16[128,128], index: 4, kind: input, shape index: {}]   ;;  %s1055_s5 = inlined_call_operand.vmem [shape: f32[1,128], index: 5, kind: input, shape index: {}]   ;;  %s1056_s6 = inlined_call_operand.hbm [shape: f32[64,128], index: 6, kind: output, shape index: {}]  }
   0x1   :  { %12 = vsyncpa [#allocation6], 0 }
   0x2   :  { %13 = vsyncpa [#allocation4], 0  ;;  %s878_s21 = smov [#allocation2]   ;;  %s806_s25 = scalar_lea.hbm %s1051_s1, 512 }
   0x3   :  { %s21_s22 = sshll.u32 %s878_s21, 4  ;;  %p807_p0 = scmp.ne.s32.totalorder %s1051_s1, %s806_s25  ;;  %s22_s22 = int_to_ptr.vmem [resolvable:$true] %s21_s22 }
   0x4   :  { %p810_p1 = scmp.lt.u32.totalorder %s806_s25, %s1051_s1 }
   0x6   :  { %p812_p2 = pnand %p810_p1, %p807_p0 }
   0x8   :  { %815 = shalt.err (!%p812_p2)
}
   0x9   :  { %s816_s30 = scalar_lea.vmem %s22_s22, 512  ;;  %p821_p4 = scmp.lt.s32.totalorder %s22_s22, %s22_s22 }
   0xa   :  { %p817_p3 = scmp.ne.s32.totalorder %s22_s22, %s816_s30  ;;  %p822_p5 = scmp.lt.s32.totalorder %s816_s30, %s816_s30 }
   0xc   :  { %p823_p6 = por %p822_p5, %p821_p4 }
   0xe   :  { %p824_p7 = pnand %p823_p6, %p817_p3 }
  0x10   :  { %827 = shalt.err (!%p824_p7)
}
  0x11   :  { %s879_s7 = smov 64   ;;  %s880_s8 = smov 4  }
  0x12   :  { %27 = dma.hbm_to_vmem [thread:$0]  %s1051_s1, 512, %s22_s22, [#allocation3], %s879_s7, %s879_s7, %s880_s8  }
  0x13   :  { %s881_s11 = smov [#allocation5]   ;;  %s828_s15 = scalar_lea.hbm %s1052_s2, 256 }
  0x14   :  { %s33_s12 = sshll.u32 %s881_s11, 4  ;;  %p829_p8 = scmp.ne.s32.totalorder %s1052_s2, %s828_s15  ;;  %s34_s12 = int_to_ptr.vmem [resolvable:$true] %s33_s12 }
  0x15   :  { %p832_p9 = scmp.lt.u32.totalorder %s828_s15, %s1052_s2 }
  0x17   :  { %p834_p10 = pnand %p832_p9, %p829_p8 }
  0x19   :  { %837 = shalt.err (!%p834_p10)
}
  0x1a   :  { %s838_s20 = scalar_lea.vmem %s34_s12, 256  ;;  %p843_p12 = scmp.lt.s32.totalorder %s34_s12, %s34_s12 }
  0x1b   :  { %p839_p11 = scmp.ne.s32.totalorder %s34_s12, %s838_s20  ;;  %p844_p13 = scmp.lt.s32.totalorder %s838_s20, %s838_s20 }
  0x1d   :  { %p845_p0 = por %p844_p13, %p843_p12 }
  0x1f   :  { %p846_p1 = pnand %p845_p0, %p839_p11 }
  0x21   :  { %849 = shalt.err (!%p846_p1)
}
  0x22   :  { %39 = dma.hbm_to_vmem [thread:$0]  %s1052_s2, 256, %s34_s12, [#allocation6], %s879_s7, %s879_s7, %s880_s8  }
  0x23   :  { %872 = dma.done.wait [#allocation3], 512  }
  0x24   :  { %873 = vsyncadd [#allocation3], 4294966784 }
  0x25   :  { %874 = dma.done.wait [#allocation6], 256  }
  0x26   :  { %875 = vsyncadd [#allocation6], 4294967040  ;;  %v756_v0 = vld [vmem:[#allocation5] sm:$0xff]   ;;  %v757_v1 = vld [vmem:[#allocation5 + $0x8] sm:$0xff]   ;;  %vm105_vm0 = vcmask 261120   ;;  %vm214_vm1 = vcmask 523264  }
  0x27   :  { %681 = vmatprep.subr.bf16.mxu0 %v756_v0  ;;  %v758_v2 = vld [vmem:[%s1050_s0] sm:$0xff]   ;;  %v759_v3 = vld [vmem:[%s1050_s0 + $0x8] sm:$0xff]   ;;  %v760_v4 = vld [vmem:[%s1050_s0 + $0x10] sm:$0xff]  }
  0x28   :  { %682 = vmatpush3.bf16.msra.mxu0 %v756_v0  ;;  %685 = vmatprep.mubr.msk.bf16.mxu0 %vm105_vm0, %v758_v2  ;;  %v761_v5 = vld [vmem:[%s1050_s0 + $0x18] sm:$0xff]   ;;  %v762_v6 = vld [vmem:[#allocation2] sm:$0xff]   ;;  %v767_v8 = vld [vmem:[%s1054_s4 + $0x8] sm:$0xff]  }
  0x29   :  { %683 = vmatprep.subr.bf16.mxu0 %v757_v1  ;;  %701 = vmatprep.mubr.msk.bf16.mxu1 %vm214_vm1, %v762_v6  ;;  %v766_v7 = vld [vmem:[%s1054_s4] sm:$0xff]   ;;  %v768_v9 = vld [vmem:[%s1054_s4 + $0x10] sm:$0xff]   ;;  %v769_v10 = vld [vmem:[%s1054_s4 + $0x18] sm:$0xff]  }
  0x2a   :  { %v770_v11 = vld [vmem:[%s1054_s4 + $0x20] sm:$0xff]   ;;  %v771_v12 = vld [vmem:[%s1054_s4 + $0x28] sm:$0xff]   ;;  %v977_v26 = vld [vmem:[#allocation2 + $0x10] sm:$0xff]  }
  0x2b   :  { %v975_v25 = vld [vmem:[#allocation2 + $0x8] sm:$0xff]   ;;  %v983_v27 = vld [vmem:[#allocation2 + $0x18] sm:$0xff]   ;;  %v772_v28 = vld [vmem:[%s1054_s4 + $0x30] sm:$0xff]  }
  0x2c   :  { %684 = vmatpush3.bf16.msra.mxu0 %v757_v1  ;;  %v773_v29 = vld [vmem:[%s1054_s4 + $0x38] sm:$0xff]   ;;  %v625_v30 = vld [vmem:[%s1053_s3] ss:$0 sm:$0xff] }
  0x2d   :  { %709 = vmatprep.subr.bf16.mxu0 %v766_v7 }
  0x2f   :  { %686 = vmatmul.mubr.msk.bf16.vlgmr.msra.gmra.mrb[0].mxu0 %vm105_vm0, %v759_v3 }
  0x30   :  { %689 = vmatprep.mubr.msk.bf16.mxu0 %vm105_vm0, %v760_v4  ;;  %710 = vmatpush3.bf16.msra.mxu0 %v766_v7  ;;  %v642_v7 = vld [vmem:[%s1055_s5] ss:$0 sm:$0xff]  ;;  %s882_s5 = smov [#allocation7]  }
  0x31   :  { %711 = vmatprep.subr.bf16.mxu0 %v767_v8  ;;  %s602_s21 = sshll.u32 %s882_s5, 4  ;;  %s603_s21 = int_to_ptr.vmem [resolvable:$true] %s602_s21 }
  0x32   :  { %s850_s22 = scalar_lea.vmem %s603_s21, 1024  ;;  %p855_p3 = scmp.lt.s32.totalorder %s603_s21, %s603_s21 }
  0x33   :  { %p851_p2 = scmp.ne.s32.totalorder %s603_s21, %s850_s22  ;;  %p856_p4 = scmp.lt.s32.totalorder %s850_s22, %s850_s22 }
  0x34   :  { %712 = vmatpush3.bf16.msra.mxu0 %v767_v8 }
  0x35   :  { %713 = vmatprep.subr.bf16.mxu0 %v768_v9  ;;  %p857_p5 = por %p856_p4, %p855_p3 }
  0x37   :  { %690 = vmatmul.mubr.msk.bf16.gmra.mrb[4].mxu0 %vm105_vm0, %v761_v5  ;;  %p858_p6 = pnand %p857_p5, %p851_p2 }
  0x38   :  { %714 = vmatpush3.bf16.msra.mxu0 %v768_v9 }
  0x39   :  { %715 = vmatprep.subr.bf16.mxu0 %v769_v10 }
  0x3c   :  { %716 = vmatpush3.bf16.msra.mxu0 %v769_v10 }
  0x3d   :  { %717 = vmatprep.subr.bf16.mxu0 %v770_v11 }
  0x40   :  { %718 = vmatpush3.bf16.msra.mxu0 %v770_v11 }
  0x41   :  { %719 = vmatprep.subr.bf16.mxu0 %v771_v12 }
  0x44   :  { %720 = vmatpush3.bf16.msra.mxu0 %v771_v12 }
  0x45   :  { %721 = vmatprep.subr.bf16.mxu0 %v772_v28 }
  0x48   :  { %722 = vmatpush3.bf16.msra.mxu0 %v772_v28 }
  0x49   :  { %723 = vmatprep.subr.bf16.mxu0 %v773_v29 }
  0x4c   :  { %724 = vmatpush3.bf16.msra.mxu0 %v773_v29 }
 0x102   :  { %v687_v13 = vpop.f32.mrb[0].mxu0 }
 0x103   :  { %v152_v14 = vpop.f32.mrb[1].mxu0 }
 0x104   :  { %v688_v15 = vpop.f32.mrb[2].mxu0 }
 0x105   :  { %v184_v16 = vpack.c.bf16 %v688_v15, %v687_v13  ;;  %v155_v17 = vpop.f32.mrb[3].mxu0 }
 0x106   :  { %v183_v18 = vpack.c.bf16 %v155_v17, %v152_v14 }
 0x108   :  { %693 = vmatprep.subr.bf16.mxu1 %v183_v18 }
 0x109   :  { %694 = vmatpush3.bf16.msra.mxu1 %v183_v18 }
 0x10a   :  { %v691_v19 = vpop.f32.mrb[4].mxu0  ;;  %695 = vmatprep.subr.bf16.mxu1 %v184_v16 }
 0x10b   :  { %v168_v20 = vpop.f32.mrb[5].mxu0 }
 0x10c   :  { %v692_v21 = vpop.f32.mrb[6].mxu0 }
 0x10d   :  { %v186_v22 = vpack.c.bf16 %v692_v21, %v691_v19  ;;  %v171_v23 = vpop.f32.mrb[7].mxu0  ;;  %696 = vmatpush3.bf16.msra.mxu1 %v184_v16 }
 0x10e   :  { %v185_v24 = vpack.c.bf16 %v171_v23, %v168_v20 }
 0x110   :  { %697 = vmatprep.subr.bf16.mxu1 %v185_v24 }
 0x111   :  { %698 = vmatpush3.bf16.msra.mxu1 %v185_v24 }
 0x112   :  { %699 = vmatprep.subr.bf16.mxu1 %v186_v22 }
 0x115   :  { %700 = vmatpush3.bf16.msra.mxu1 %v186_v22 }
 0x118   :  { %702 = vmatmul.mubr.msk.bf16.vlgmr.msra.gmra.mrb[0].mxu1 %vm214_vm1, %v975_v25 }
 0x119   :  { %705 = vmatprep.mubr.msk.bf16.mxu1 %vm214_vm1, %v977_v26 }
 0x120   :  { %706 = vmatmul.mubr.msk.bf16.gmra.mrb[4].mxu1 %vm214_vm1, %v983_v27 }
 0x121   :  { %741 = vmatprep.mubr.msk.bf16.mxu1 %vm214_vm1, %v762_v6 }
 0x1eb   :  { %v703_v31 = vpop.f32.mrb[0].mxu1 }
 0x1ec   :  { %v270_v32 = vadd.f32 %v703_v31, %v625_v30  ;;  %v261_v33 = vpop.f32.mrb[1].mxu1 }
 0x1ed   :  { %v262_v34 = vadd.f32 %v625_v30, %v261_v33  ;;  %v704_v35 = vpop.f32.mrb[2].mxu1 }
 0x1ee   :  { %v273_v36 = vadd.f32 %v704_v35, %v625_v30  ;;  %v264_v37 = vpop.f32.mrb[3].mxu1  ;;  %v294_v39 = vmax.f32 %v270_v32, 0.0 }
 0x1ef   :  { %v265_v38 = vadd.f32 %v625_v30, %v264_v37  ;;  %v292_v41 = vmax.f32 %v262_v34, 0.0 }
 0x1f0   :  { %v295_v40 = vmax.f32 %v273_v36, 0.0 }
 0x1f1   :  { %v293_v42 = vmax.f32 %v265_v38, 0.0 }
 0x1f2   :  { %v301_v43 = vpack.c.bf16 %v295_v40, %v294_v39 }
 0x1f3   :  { %v300_v44 = vpack.c.bf16 %v293_v42, %v292_v41  ;;  %v707_v45 = vpop.f32.mrb[4].mxu1 }
 0x1f4   :  { %v286_v46 = vadd.f32 %v707_v45, %v625_v30  ;;  %v277_v47 = vpop.f32.mrb[5].mxu1 }
 0x1f5   :  { %v278_v48 = vadd.f32 %v625_v30, %v277_v47  ;;  %v708_v49 = vpop.f32.mrb[6].mxu1  ;;  %725 = vmatprep.mubr.bf16.mxu0 %v300_v44 }
 0x1f6   :  { %v289_v50 = vadd.f32 %v708_v49, %v625_v30  ;;  %v280_v51 = vpop.f32.mrb[7].mxu1  ;;  %726 = vmatmul.mubr.bf16.vlgmr.msra.gmra.mrb[8].mxu0 %v301_v43  ;;  %v298_v53 = vmax.f32 %v286_v46, 0.0 }
 0x1f7   :  { %v281_v52 = vadd.f32 %v625_v30, %v280_v51  ;;  %v296_v55 = vmax.f32 %v278_v48, 0.0 }
 0x1f8   :  { %v299_v54 = vmax.f32 %v289_v50, 0.0 }
 0x1f9   :  { %v297_v56 = vmax.f32 %v281_v52, 0.0 }
 0x1fa   :  { %v303_v57 = vpack.c.bf16 %v299_v54, %v298_v53 }
 0x1fb   :  { %v302_v58 = vpack.c.bf16 %v297_v56, %v296_v55 }
 0x1fd   :  { %729 = vmatprep.mubr.bf16.mxu0 %v302_v58 }
 0x1fe   :  { %730 = vmatmul.mubr.bf16.gmra.mrb[12].mxu0 %v303_v57 }
 0x2c9   :  { %v727_v59 = vpop.f32.mrb[8].mxu0 }
 0x2ca   :  { %v402_v60 = vpop.f32.mrb[9].mxu0 }
 0x2cb   :  { %v728_v61 = vpop.f32.mrb[10].mxu0 }
 0x2cc   :  { %v434_v62 = vpack.c.bf16 %v728_v61, %v727_v59  ;;  %v405_v63 = vpop.f32.mrb[11].mxu0 }
 0x2cd   :  { %v433_v0 = vpack.c.bf16 %v405_v63, %v402_v60 }
 0x2cf   :  { %733 = vmatprep.subr.bf16.mxu1 %v433_v0 }
 0x2d0   :  { %734 = vmatpush3.bf16.msra.mxu1 %v433_v0 }
 0x2d1   :  { %v731_v1 = vpop.f32.mrb[12].mxu0  ;;  %735 = vmatprep.subr.bf16.mxu1 %v434_v62 }
 0x2d2   :  { %v418_v2 = vpop.f32.mrb[13].mxu0 }
 0x2d3   :  { %v732_v3 = vpop.f32.mrb[14].mxu0 }
 0x2d4   :  { %v436_v4 = vpack.c.bf16 %v732_v3, %v731_v1  ;;  %v421_v5 = vpop.f32.mrb[15].mxu0  ;;  %736 = vmatpush3.bf16.msra.mxu1 %v434_v62 }
 0x2d5   :  { %v435_v6 = vpack.c.bf16 %v421_v5, %v418_v2 }
 0x2d7   :  { %737 = vmatprep.subr.bf16.mxu1 %v435_v6 }
 0x2d8   :  { %738 = vmatpush3.bf16.msra.mxu1 %v435_v6 }
 0x2d9   :  { %739 = vmatprep.subr.bf16.mxu1 %v436_v4 }
 0x2dc   :  { %740 = vmatpush3.bf16.msra.mxu1 %v436_v4 }
 0x2df   :  { %742 = vmatmul.mubr.msk.bf16.vlgmr.msra.gmra.mrb[8].mxu1 %vm214_vm1, %v975_v25 }
 0x2e0   :  { %745 = vmatprep.mubr.msk.bf16.mxu1 %vm214_vm1, %v977_v26 }
 0x2e7   :  { %746 = vmatmul.mubr.msk.bf16.gmra.mrb[12].mxu1 %vm214_vm1, %v983_v27 }
 0x3b2   :  { %v743_v8 = vpop.f32.mrb[8].mxu1 }
 0x3b3   :  { %v487_v9 = vadd.f32 %v743_v8, %v642_v7  ;;  %v478_v10 = vpop.f32.mrb[9].mxu1 }
 0x3b4   :  { %v479_v11 = vadd.f32 %v642_v7, %v478_v10  ;;  %v744_v12 = vpop.f32.mrb[10].mxu1 }
 0x3b5   :  { %513 = vmax.xlane.f32.xlu1 %v487_v9  ;;  %v481_v13 = vpop.f32.mrb[11].mxu1  ;;  %v490_v14 = vadd.f32 %v744_v12, %v642_v7 }
 0x3b6   :  { %509 = vmax.xlane.f32.xlu0 %v479_v11  ;;  %v482_v15 = vadd.f32 %v642_v7, %v481_v13 }
 0x3b9   :  { %515 = vmax.xlane.f32.xlu1 %v490_v14 }
 0x3ba   :  { %v747_v16 = vpop.f32.mrb[12].mxu1  ;;  %511 = vmax.xlane.f32.xlu0 %v482_v15 }
 0x3bb   :  { %v494_v17 = vpop.f32.mrb[13].mxu1  ;;  %v503_v22 = vadd.f32 %v747_v16, %v642_v7 }
 0x3bc   :  { %v495_v18 = vadd.f32 %v642_v7, %v494_v17  ;;  %v748_v19 = vpop.f32.mrb[14].mxu1 }
 0x3bd   :  { %v497_v20 = vpop.f32.mrb[15].mxu1  ;;  %v506_v23 = vadd.f32 %v748_v19, %v642_v7 }
 0x3be   :  { %v498_v21 = vadd.f32 %v642_v7, %v497_v20  ;;  %517 = vmax.xlane.f32.xlu0 %v495_v18 }
 0x3c0   :  { %519 = vmax.xlane.f32.xlu1 %v498_v21 }
 0x3c2   :  { %521 = vmax.xlane.f32.xlu0 %v503_v22 }
 0x3c4   :  { %523 = vmax.xlane.f32.xlu1 %v506_v23 }
 0x442   :  { %v514_v24 = vpop.xlane.xlu1 %513 }
 0x443   :  { %v1006_v25 = vsub.f32 %v487_v9, %v514_v24  ;;  %v510_v26 = vpop.xlane.xlu0 %509 }
 0x444   :  { %v1008_v27 = vsub.f32 %v479_v11, %v510_v26 }
 0x445   :  { %v537_v28 = vmul.f32 1.442695, %v1006_v25 }
 0x446   :  { %v533_v29 = vmul.f32 1.442695, %v1008_v27  ;;  %v516_v30 = vpop.xlane.xlu1 %515 }
 0x447   :  { %774 = vpow2.f32 %v537_v28  ;;  %v1012_v31 = vsub.f32 %v490_v14, %v516_v30  ;;  %v512_v32 = vpop.xlane.xlu0 %511 }
 0x448   :  { %v1014_v33 = vsub.f32 %v482_v15, %v512_v32  ;;  %776 = vpow2.f32 %v533_v29 }
 0x449   :  { %v539_v34 = vmul.f32 1.442695, %v1012_v31 }
 0x44a   :  { %v535_v35 = vmul.f32 1.442695, %v1014_v33 }
 0x44b   :  { %778 = vpow2.f32 %v539_v34  ;;  %v518_v36 = vpop.xlane.xlu0 %517 }
 0x44c   :  { %v1018_v37 = vsub.f32 %v495_v18, %v518_v36  ;;  %780 = vpow2.f32 %v535_v35 }
 0x44d   :  { %v520_v38 = vpop.xlane.xlu1 %519 }
 0x44e   :  { %v541_v39 = vmul.f32 1.442695, %v1018_v37  ;;  %v1021_v40 = vsub.f32 %v498_v21, %v520_v38 }
 0x44f   :  { %v522_v41 = vpop.xlane.xlu0 %521 }
 0x450   :  { %782 = vpow2.f32 %v541_v39  ;;  %v543_v42 = vmul.f32 1.442695, %v1021_v40  ;;  %v1024_v43 = vsub.f32 %v503_v22, %v522_v41 }
 0x451   :  { %v775_v44 = vpop.eup %774  ;;  %v524_v45 = vpop.xlane.xlu1 %523 }
 0x452   :  { %784 = vpow2.f32 %v543_v42  ;;  %v545_v46 = vmul.f32 1.442695, %v1024_v43  ;;  %v1027_v47 = vsub.f32 %v506_v23, %v524_v45  ;;  %553 = vadd.xlane.f32.xlu0 %v775_v44  ;;  %v777_v48 = vpop.eup %776 }
 0x454   :  { %786 = vpow2.f32 %v545_v46  ;;  %v547_v49 = vmul.f32 1.442695, %v1027_v47 }
 0x455   :  { %v779_v50 = vpop.eup %778 }
 0x456   :  { %788 = vpow2.f32 %v547_v49  ;;  %555 = vadd.xlane.f32.xlu1 %v779_v50  ;;  %549 = vadd.xlane.f32.xlu0 %v777_v48  ;;  %v781_v51 = vpop.eup %780 }
 0x45a   :  { %v783_v52 = vpop.eup %782  ;;  %551 = vadd.xlane.f32.xlu1 %v781_v51 }
 0x45b   :  { %557 = vadd.xlane.f32.xlu0 %v783_v52 }
 0x45c   :  { %v785_v53 = vpop.eup %784 }
 0x45e   :  { %v787_v54 = vpop.eup %786  ;;  %559 = vadd.xlane.f32.xlu1 %v785_v53 }
 0x45f   :  { %561 = vadd.xlane.f32.xlu0 %v787_v54 }
 0x460   :  { %v789_v55 = vpop.eup %788 }
 0x462   :  { %563 = vadd.xlane.f32.xlu1 %v789_v55 }
 0x4df   :  { %v554_v56 = vpop.xlane.xlu0 %553 }
 0x4e0   :  { %790 = vlog2.f32 %v554_v56 }
 0x4e3   :  { %v556_v57 = vpop.xlane.xlu1 %555  ;;  %v550_v58 = vpop.xlane.xlu0 %549 }
 0x4e4   :  { %792 = vlog2.f32 %v556_v57 }
 0x4e5   :  { %794 = vlog2.f32 %v550_v58 }
 0x4e7   :  { %v552_v59 = vpop.xlane.xlu1 %551 }
 0x4e8   :  { %796 = vlog2.f32 %v552_v59  ;;  %v558_v60 = vpop.xlane.xlu0 %557 }
 0x4e9   :  { %798 = vlog2.f32 %v558_v60 }
 0x4ea   :  { %v791_v61 = vpop.eup %790 }
 0x4eb   :  { %v570_v62 = vmul.f32 0.6931472, %v791_v61  ;;  %v560_v63 = vpop.xlane.xlu1 %559 }
 0x4ec   :  { %800 = vlog2.f32 %v560_v63  ;;  %v562_v0 = vpop.xlane.xlu0 %561 }
 0x4ed   :  { %v583_v1 = vsub.f32 %v1006_v25, %v570_v62  ;;  %802 = vlog2.f32 %v562_v0 }
 0x4ee   :  { %v793_v2 = vpop.eup %792 }
 0x4ef   :  { %v795_v3 = vpop.eup %794  ;;  %591 = vst [vmem:[#allocation7 + $0x10] sm:$0xff] %v583_v1  ;;  %v572_v4 = vmul.f32 0.6931472, %v793_v2  ;;  %v564_v5 = vpop.xlane.xlu1 %563 }
 0x4f0   :  { %v566_v6 = vmul.f32 0.6931472, %v795_v3  ;;  %804 = vlog2.f32 %v564_v5 }
 0x4f1   :  { %v584_v7 = vsub.f32 %v1012_v31, %v572_v4 }
 0x4f2   :  { %v797_v8 = vpop.eup %796  ;;  %v581_v9 = vsub.f32 %v1008_v27, %v566_v6 }
 0x4f3   :  { %v799_v10 = vpop.eup %798  ;;  %592 = vst [vmem:[#allocation7 + $0x18] sm:$0xff] %v584_v7  ;;  %v568_v11 = vmul.f32 0.6931472, %v797_v8 }
 0x4f4   :  { %589 = vst [vmem:[#allocation7] sm:$0xff] %v581_v9  ;;  %v574_v12 = vmul.f32 0.6931472, %v799_v10 }
 0x4f5   :  { %v582_v13 = vsub.f32 %v1014_v33, %v568_v11 }
 0x4f6   :  { %v801_v14 = vpop.eup %800  ;;  %v585_v15 = vsub.f32 %v1018_v37, %v574_v12 }
 0x4f7   :  { %v803_v16 = vpop.eup %802  ;;  %590 = vst [vmem:[#allocation7 + $0x8] sm:$0xff] %v582_v13  ;;  %v576_v17 = vmul.f32 0.6931472, %v801_v14 }
 0x4f8   :  { %593 = vst [vmem:[#allocation7 + $0x20] sm:$0xff] %v585_v15  ;;  %v578_v18 = vmul.f32 0.6931472, %v803_v16 }
 0x4f9   :  { %v586_v19 = vsub.f32 %v1021_v40, %v576_v17 }
 0x4fa   :  { %v805_v20 = vpop.eup %804  ;;  %v587_v21 = vsub.f32 %v1024_v43, %v578_v18 }
 0x4fb   :  { %594 = vst [vmem:[#allocation7 + $0x28] sm:$0xff] %v586_v19  ;;  %v580_v22 = vmul.f32 0.6931472, %v805_v20 }
 0x4fc   :  { %595 = vst [vmem:[#allocation7 + $0x30] sm:$0xff] %v587_v21 }
 0x4fd   :  { %v588_v23 = vsub.f32 %v1027_v47, %v580_v22 }
 0x4ff   :  { %596 = vst [vmem:[#allocation7 + $0x38] sm:$0xff] %v588_v23 }
 0x500   :  { %861 = shalt.err (!%p858_p6)
}
 0x501   :  { %s862_s25 = scalar_lea.hbm %s1056_s6, 1024 }
 0x502   :  { %p863_p7 = scmp.ne.s32.totalorder %s1056_s6, %s862_s25  ;;  %p866_p8 = scmp.lt.u32.totalorder %s862_s25, %s1056_s6 }
 0x504   :  { %p868_p9 = pnand %p866_p8, %p863_p7 }
 0x506   :  { %871 = shalt.err (!%p868_p9)
}
 0x507   :  { %s883_s29 = smov 128   ;;  %s884_s30 = smov 8  }
 0x508   :  { %608 = dma.vmem_to_hbm [thread:$0]  %s603_s21, 1024, %s1056_s6, [#allocation4], %s883_s29, %s883_s29, %s884_s30  }
 0x509   :  { %876 = dma.done.wait [#allocation4], 1024  }
 0x50a   :  { %877 = vsyncadd [#allocation4], 4294966272 }
 0x50b   :  { %612 = vsyncpa [#allocation3], 1 }
 0x50c   :  { %613 = vsyncpa [#allocation6], 1 }
 0x50d   :  { %614 = vsyncpa [#allocation4], 1 }

</bundles_post_ra>
